<compile_context>
chip_gen: v7x
topology: tpu7x:2x2x1
jax: 0.10.0
libtpu: 0.0.40
codegen_flags: <defaults>
</compile_context>

<pallas_src>
import jax
import jax.numpy as jnp
from jax.experimental import pallas as pl
from jax.experimental.pallas import tpu as pltpu


def _bilstm_step_kernel(slab_ref, w_ref, out_ref):
    """Single LSTM step, both directions fused into one MXU pass.

    slab_ref: (2, K) f32   row 0 = [x | h0_fwd | h0_bwd | 1],
                           row 1 = [c0_fwd | c0_bwd | zero-pad]
    w_ref   : (K, 8H) bf16 packed block weight matrix (bias row folded in);
                           columns = [i_f i_b | f_f f_b | o_f o_b | g_f g_b]
    out_ref : (1, 4H) f32  [h_fwd | h_bwd | c_fwd | c_bwd]
    """
    H2 = out_ref.shape[-1] // 2                      # 2 * hidden_size

    # Native bf16 x bf16 MXU path, f32 accumulation (bias comes for free via
    # the constant-1 column in row 0 and the bias row in W).
    z = slab_ref[0:1, :].astype(jnp.bfloat16)        # (1, K)
    gates = jnp.dot(z, w_ref[...], preferred_element_type=jnp.float32)  # (1, 8H)

    c0 = slab_ref[1:2, :H2]                          # (1, 2H) f32

    # Contiguous activations: sigmoid over [i | f | o], tanh over [g].
    sig = jax.nn.sigmoid(gates[:, :3 * H2])          # (1, 6H)
    g_g = jnp.tanh(gates[:, 3 * H2:])                # (1, 2H)
    i_g = sig[:, 0 * H2:1 * H2]
    f_g = sig[:, 1 * H2:2 * H2]
    o_g = sig[:, 2 * H2:3 * H2]

    c_new = f_g * c0 + i_g * g_g                     # (1, 2H) f32
    h_new = o_g * jnp.tanh(c_new)                    # (1, 2H) f32

    # Single lane-dense 128-lane store.
    out_ref[...] = jnp.concatenate([h_new, c_new], axis=-1)


def encoder_forward(inputs, hidden, w_packed):
    """Mirrors Encoder.forward: returns (output, (h_n, c_n)).

    output: (1, 1, 2*hidden)   h_n, c_n: (2, 1, hidden)
    """
    h0, c0 = hidden
    num_dir, _, H = h0.shape                         # (2, 1, H)
    K = w_packed.shape[0]                            # I + 2H + 1
    I = K - num_dir * H - 1

    x = inputs.reshape(1, I).astype(jnp.float32)     # == inputs.view(1, 1, input_size)
    one = jnp.ones((1, 1), jnp.float32)
    row0 = jnp.concatenate([x, h0[0], h0[1], one], axis=-1)              # (1, K)
    row1 = jnp.concatenate(
        [c0[0], c0[1], jnp.zeros((1, K - num_dir * H), jnp.float32)], axis=-1)
    slab = jnp.concatenate([row0, row1], axis=0)     # (2, K) f32

    vmem = pl.BlockSpec(memory_space=pltpu.MemorySpace.VMEM)
    out = pl.pallas_call(
        _bilstm_step_kernel,
        out_shape=jax.ShapeDtypeStruct((1, 4 * H), jnp.float32),
        in_specs=[vmem, vmem],
        out_specs=vmem,
    )(slab, w_packed)

    h_flat = out[:, :2 * H]                          # [h_fwd | h_bwd]
    c_flat = out[:, 2 * H:]                          # [c_fwd | c_bwd]
    output = h_flat.reshape(1, 1, 2 * H)             # seq_len == 1 bidirectional output
    h_n = h_flat.reshape(num_dir, 1, H)
    c_n = c_flat.reshape(num_dir, 1, H)
    return output, (h_n, c_n)


def init_encoder_params(key, input_size, hidden_size):
    """Raw per-direction params in PyTorch nn.LSTM layout/init:
       wih: (2, 4H, I), whh: (2, 4H, H), bih: (2, 4H), bhh: (2, 4H);
       gate order [i, f, g, o]."""
    bound = 1.0 / (hidden_size ** 0.5)
    keys = jax.random.split(key, 8)
    u = lambda k, shape: jax.random.uniform(k, shape, jnp.float32, -bound, bound)
    wih = jnp.stack([u(keys[0], (4 * hidden_size, input_size)),
                     u(keys[1], (4 * hidden_size, input_size))])
    whh = jnp.stack([u(keys[2], (4 * hidden_size, hidden_size)),
                     u(keys[3], (4 * hidden_size, hidden_size))])
    bih = jnp.stack([u(keys[4], (4 * hidden_size,)), u(keys[5], (4 * hidden_size,))])
    bhh = jnp.stack([u(keys[6], (4 * hidden_size,)), u(keys[7], (4 * hidden_size,))])
    return wih, whh, bih, bhh


def pack_encoder_params(raw_params, weights_dtype=jnp.bfloat16):
    """One-time repack: fold both directions, both matmuls AND both biases into
    a single (I + 2H + 1, 8H) block weight matrix.

    Column layout (each block H wide): [i_f i_b  f_f f_b  o_f o_b  g_f g_b]
    Row layout:  [x (I rows) | h_fwd (H) | h_bwd (H) | bias row (1)]
    The W_hh part is block-diagonal per direction (zero blocks are free on MXU).
    """
    wih, whh, bih, bhh = raw_params
    num_dir, fourH, I = wih.shape
    H = fourH // 4
    K = I + num_dir * H + 1
    W = jnp.zeros((K, num_dir * fourH), jnp.float32)
    gate_order = (0, 1, 3, 2)                 # PyTorch [i, f, g, o] -> packed [i, f, o, g]
    for pos, t in enumerate(gate_order):
        for d in range(num_dir):              # direction: fwd, bwd (adjacent per gate)
            col = (pos * num_dir + d) * H
            W = W.at[:I, col:col + H].set(wih[d, t * H:(t + 1) * H, :].T)
            W = W.at[I + d * H:I + (d + 1) * H, col:col + H].set(
                whh[d, t * H:(t + 1) * H, :].T)
            W = W.at[K - 1, col:col + H].set(
                bih[d, t * H:(t + 1) * H] + bhh[d, t * H:(t + 1) * H])
    return W.astype(weights_dtype)


def init_hidden(hidden_size, bidirectional=True):
    n = 1 + int(bidirectional)
    return (jnp.zeros((n, 1, hidden_size), jnp.float32),
            jnp.zeros((n, 1, hidden_size), jnp.float32))


def _reference_forward(inputs, hidden, raw_params, weights_dtype=jnp.bfloat16):
    """Pure-JAX reference of the single-step bidirectional LSTM, using the same
    bf16-rounded operands (weights, biases, activations) the MXU sees; state
    and accumulation stay f32, matching the kernel."""
    h0, c0 = hidden
    wih, whh, bih, bhh = raw_params
    num_dir, fourH, I = wih.shape
    H = fourH // 4
    q = lambda a: a.astype(weights_dtype).astype(jnp.float32)
    x = q(inputs.reshape(1, I))
    hs, cs = [], []
    for d in range(num_dir):
        gates = (jnp.dot(x, q(wih[d]).T, precision='highest')
                 + jnp.dot(q(h0[d]), q(whh[d]).T, precision='highest')
                 + q(bih[d] + bhh[d]))
        i_g = jax.nn.sigmoid(gates[:, 0 * H:1 * H])
        f_g = jax.nn.sigmoid(gates[:, 1 * H:2 * H])
        g_g = jnp.tanh(gates[:, 2 * H:3 * H])
        o_g = jax.nn.sigmoid(gates[:, 3 * H:4 * H])
        c_new = f_g * c0[d] + i_g * g_g
        h_new = o_g * jnp.tanh(c_new)
        hs.append(h_new)
        cs.append(c_new)
    output = jnp.concatenate(hs, axis=-1)[None]
    return output, (jnp.stack(hs), jnp.stack(cs))


if __name__ == "__main__":
    input_size = 32
    hidden_size = 32

    key = jax.random.PRNGKey(0)
    pkey, xkey, hkey, ckey = jax.random.split(key, 4)
    raw_params = init_encoder_params(pkey, input_size, hidden_size)
    w_packed = pack_encoder_params(raw_params, weights_dtype=jnp.bfloat16)

    inputs = jax.random.normal(xkey, (input_size,), jnp.float32)

    # Case 1: zero initial hidden (matches Encoder.init_hidden()).
    hidden_zero = init_hidden(hidden_size, bidirectional=True)
    # Case 2: random hidden state (exercises the block-diagonal W_hh packing
    # and the folded bias / merged-c0 slab layout).
    hidden_rand = (jax.random.normal(hkey, (2, 1, hidden_size), jnp.float32),
                   jax.random.normal(ckey, (2, 1, hidden_size), jnp.float32))

    for hidden in (hidden_zero, hidden_rand):
        output, (h_n, c_n) = encoder_forward(inputs, hidden, w_packed)
        jax.block_until_ready((output, h_n, c_n))

        ref_out, (ref_h, ref_c) = _reference_forward(inputs, hidden, raw_params)
        assert output.shape == (1, 1, 2 * hidden_size)
        assert h_n.shape == (2, 1, hidden_size) and c_n.shape == (2, 1, hidden_size)
        assert jnp.allclose(output, ref_out, atol=1e-3, rtol=1e-3)
        assert jnp.allclose(h_n, ref_h, atol=1e-3, rtol=1e-3)
        assert jnp.allclose(c_n, ref_c, atol=1e-3, rtol=1e-3)

    print("KERNEL_OK")
</pallas_src>

<mosaic_0001>
module attributes {stable_mosaic.version = 11 : i64} {
  func.func @_bilstm_step_kernel(%arg0: memref<2x97xf32, #tpu.memory_space<vmem>>, %arg1: memref<97x256xbf16, #tpu.memory_space<vmem>>, %arg2: memref<1x128xf32, #tpu.memory_space<vmem>>) attributes {dimension_semantics = [], scalar_prefetch = 0 : i64, scratch_operands = 0 : i64, tpu.core_type = #tpu.core_type<tc>} {
    %c0 = arith.constant 0 : index
    %c0_0 = arith.constant 0 : index
    %0 = vector.load %arg0[%c0, %c0_0] : memref<2x97xf32, #tpu.memory_space<vmem>>, vector<1x97xf32>
    %1 = arith.truncf %0 : vector<1x97xf32> to vector<1x97xbf16>
    %c0_1 = arith.constant 0 : index
    %c0_2 = arith.constant 0 : index
    %2 = vector.load %arg1[%c0_1, %c0_2] : memref<97x256xbf16, #tpu.memory_space<vmem>>, vector<97x256xbf16>
    %cst = arith.constant dense<0.000000e+00> : vector<1x256xf32>
    %3 = tpu.matmul %1, %2, %cst {dimension_numbers = #tpu.dot_dimension_numbers<[1], [0], [0], [1], [0, 0, 1, 1], [], []>} : vector<1x97xbf16>, vector<97x256xbf16>, vector<1x256xf32> -> vector<1x256xf32>
    %c1 = arith.constant 1 : index
    %c0_3 = arith.constant 0 : index
    %4 = vector.load %arg0[%c1, %c0_3] : memref<2x97xf32, #tpu.memory_space<vmem>>, vector<1x64xf32>
    %5 = vector.extract_strided_slice %3 {offsets = [0, 0], sizes = [1, 192], strides = [1, 1]} : vector<1x256xf32> to vector<1x192xf32>
    %6 = arith.negf %5 : vector<1x192xf32>
    %7 = math.exp %6 : vector<1x192xf32>
    %cst_4 = arith.constant 1.000000e+00 : f32
    %8 = vector.broadcast %cst_4 : f32 to vector<1x192xf32>
    %9 = arith.addf %8, %7 : vector<1x192xf32>
    %10 = arith.divf %8, %9 : vector<1x192xf32>
    %11 = vector.extract_strided_slice %3 {offsets = [0, 192], sizes = [1, 64], strides = [1, 1]} : vector<1x256xf32> to vector<1x64xf32>
    %12 = math.tanh %11 : vector<1x64xf32>
    %13 = vector.extract_strided_slice %10 {offsets = [0, 0], sizes = [1, 64], strides = [1, 1]} : vector<1x192xf32> to vector<1x64xf32>
    %14 = vector.extract_strided_slice %10 {offsets = [0, 64], sizes = [1, 64], strides = [1, 1]} : vector<1x192xf32> to vector<1x64xf32>
    %15 = vector.extract_strided_slice %10 {offsets = [0, 128], sizes = [1, 64], strides = [1, 1]} : vector<1x192xf32> to vector<1x64xf32>
    %16 = arith.mulf %14, %4 : vector<1x64xf32>
    %17 = arith.mulf %13, %12 : vector<1x64xf32>
    %18 = arith.addf %16, %17 : vector<1x64xf32>
    %19 = math.tanh %18 : vector<1x64xf32>
    %20 = arith.mulf %15, %19 : vector<1x64xf32>
    %21 = tpu.concatenate %20, %18 in 1 : vector<1x64xf32>, vector<1x64xf32> -> vector<1x128xf32>
    %c0_5 = arith.constant 0 : index
    %c0_6 = arith.constant 0 : index
    %22 = vector.load %arg2[%c0_5, %c0_6] : memref<1x128xf32, #tpu.memory_space<vmem>>, vector<1x128xf32>
    tpu.vector_store %arg2[%c0_5, %c0_6], %21 {strides = array<i32>} : memref<1x128xf32, #tpu.memory_space<vmem>>, vector<1x128xf32>,
    return
  }
}

</mosaic_0001>

<bundles_post_ra>
// kernel: tpu_custom_call.1
= control target key start
LH: loop header
LB: loop body
LE: loop exit
PB: predicated region body
PF: predicated region fallthrough
CT: control target
= control target key end

     0   :  { %7 = vsyncpa [#allocation3], 0  ;;  %s420_s0 = inlined_call_operand.hbm [shape: f32[2,97], index: 0, kind: input, shape index: {}]   ;;  %s421_s1 = inlined_call_operand.hbm [shape: bf16[97,256], index: 1, kind: input, shape index: {}]   ;;  %s422_s2 = inlined_call_operand.hbm [shape: f32[1,128], index: 2, kind: output, shape index: {}]  }
   0x1   :  { %8 = vsyncpa [#allocation6], 0 }
   0x2   :  { %9 = vsyncpa [#allocation4], 0  ;;  %s355_s9 = smov [#allocation2]   ;;  %s356_s11 = smov [#allocation5]  }
   0x3   :  { %s16_s10 = sshll.u32 %s355_s9, 4  ;;  %s25_s12 = sshll.u32 %s356_s11, 4  ;;  %s17_s10 = int_to_ptr.vmem [resolvable:$true] %s16_s10  ;;  %s377_s12 = int_to_ptr.vmem [resolvable:$true] %s25_s12 }
   0x4   :  { %s283_s15 = scalar_lea.hbm %s420_s0, 32 }
   0x5   :  { %p284_p0 = scmp.ne.s32.totalorder %s420_s0, %s283_s15  ;;  %p287_p1 = scmp.lt.u32.totalorder %s283_s15, %s420_s0 }
   0x7   :  { %p289_p2 = pnand %p287_p1, %p284_p0 }
   0x9   :  { %292 = shalt.err (!%p289_p2)
}
   0xa   :  { %s293_s20 = scalar_lea.vmem %s17_s10, 32  ;;  %p298_p4 = scmp.lt.s32.totalorder %s17_s10, %s17_s10 }
   0xb   :  { %p294_p3 = scmp.ne.s32.totalorder %s17_s10, %s293_s20  ;;  %p299_p5 = scmp.lt.s32.totalorder %s293_s20, %s293_s20 }
   0xd   :  { %p300_p6 = por %p299_p5, %p298_p4 }
   0xf   :  { %p301_p7 = pnand %p300_p6, %p294_p3 }
  0x11   :  { %304 = shalt.err (!%p301_p7)
}
  0x12   :  { %19 = dma.hbm_to_vmem [thread:$0]  %s420_s0, 32, %s17_s10, [#allocation3]  }
  0x13   :  { %s305_s25 = scalar_lea.hbm %s421_s1, 1664 }
  0x14   :  { %p306_p8 = scmp.ne.s32.totalorder %s421_s1, %s305_s25  ;;  %p309_p9 = scmp.lt.u32.totalorder %s305_s25, %s421_s1 }
  0x16   :  { %p311_p10 = pnand %p309_p9, %p306_p8 }
  0x18   :  { %314 = shalt.err (!%p311_p10)
}
  0x19   :  { %s315_s30 = scalar_lea.vmem %s377_s12, 1664  ;;  %p320_p12 = scmp.lt.s32.totalorder %s377_s12, %s377_s12 }
  0x1a   :  { %p316_p11 = scmp.ne.s32.totalorder %s377_s12, %s315_s30  ;;  %p321_p13 = scmp.lt.s32.totalorder %s315_s30, %s315_s30 }
  0x1c   :  { %p322_p0 = por %p321_p13, %p320_p12 }
  0x1e   :  { %p323_p1 = pnand %p322_p0, %p316_p11 }
  0x20   :  { %326 = shalt.err (!%p323_p1)
}
  0x21   :  { %s357_s0 = smov 128   ;;  %s358_s3 = smov 8  }
  0x22   :  { %31 = dma.hbm_to_vmem [thread:$0]  %s421_s1, 1664, %s377_s12, [#allocation6], %s357_s0, %s357_s0, %s358_s3  }
  0x23   :  { %349 = dma.done.wait [#allocation3], 32  }
  0x24   :  { %350 = vsyncadd [#allocation3], 4294967264 }
  0x25   :  { %351 = dma.done.wait [#allocation6], 1664  }
  0x26   :  { %352 = vsyncadd [#allocation6], 4294965632  ;;  %v359_v0 = vmov 0   ;;  %v251_v1 = vld [vmem:[#allocation5 + $0x4] ss:$8 sps:$4 sm:$0xff]   ;;  %vm123_vm0 = vcmask 1040384  }
  0x27   :  { %164 = vmatprep.mubr.bf16.mxu0 %v359_v0  ;;  %v253_v2 = vld [vmem:[#allocation5] ss:$8 sps:$4 sm:$0xff]   ;;  %132 = vmatprep.subr.bf16.mxu0 %v251_v1  ;;  %v254_v3 = vld [vmem:[#allocation5 + $0x14] ss:$8 sps:$4 sm:$0xff]   ;;  %v256_v4 = vld [vmem:[#allocation5 + $0x10] ss:$8 sps:$4 sm:$0xff]  }
  0x28   :  { %133 = vmatpush1.bf16.msra.mxu0 %v253_v2  ;;  %v257_v5 = vld [vmem:[#allocation5 + $0x24] ss:$8 sps:$4 sm:$0xff]   ;;  %v259_v6 = vld [vmem:[#allocation5 + $0x20] ss:$8 sps:$4 sm:$0xff]   ;;  %v260_v7 = vld [vmem:[#allocation5 + $0x34] ss:$8 sps:$4 sm:$0xff]  }
  0x29   :  { %134 = vmatprep.subr.bf16.mxu0 %v254_v3  ;;  %v262_v8 = vld [vmem:[#allocation5 + $0x30] ss:$8 sps:$4 sm:$0xff]   ;;  %v263_v9 = vld [vmem:[#allocation5 + $0x44] ss:$8 sps:$4 sm:$0xff]   ;;  %v265_v11 = vld [vmem:[#allocation5 + $0x40] ss:$8 sps:$4 sm:$0xff]  }
  0x2a   :  { %v53_v10 = vld [vmem:[#allocation5 + $0x60] sm:$0x11]  ;;  %v266_v12 = vld [vmem:[#allocation5 + $0x54] ss:$8 sps:$4 sm:$0xff]   ;;  %v125_v14 = vsel %vm123_vm0, 65535, %v359_v0  ;;  %vm119_vm1 = vcmask 793600  }
  0x2b   :  { %v240_v13 = vcombine.high %v53_v10, %v53_v10  ;;  %v268_v15 = vld [vmem:[#allocation5 + $0x50] ss:$8 sps:$4 sm:$0xff]   ;;  %v239_v16 = vcombine.low %v53_v10, %v53_v10  ;;  %v39_v19 = vld [vmem:[#allocation2] sm:$0x1]  ;;  %s360_s1 = smov 64   ;;  %s361_s6 = smov [#allocation7]  }
  0x2c   :  { %135 = vmatpush1.bf16.msra.mxu0 %v256_v4  ;;  %v40_v20 = vpack.c.bf16 %v39_v19, %v39_v19  ;;  %v173_v26 = vld [vmem:[#allocation2 + $0x1] sm:$0x1]  ;;  %s217_s7 = sshll.u32 %s361_s6, 4  ;;  %vm208_vm2 = vcmask 523264   ;;  %s218_s7 = int_to_ptr.vmem [resolvable:$true] %s217_s7 }
  0x2d   :  { %136 = vmatprep.subr.bf16.mxu0 %v257_v5  ;;  %v130_v17 = vand.u32 %v240_v13, %v125_v14  ;;  %v127_v18 = vand.u32 %v239_v16, %v125_v14  ;;  %s327_s8 = scalar_lea.vmem %s218_s7, 16  ;;  %s331_s9 = scalar_lea.vmem %s218_s7, 32 }
  0x2e   :  { %p328_p2 = scmp.ne.s32.totalorder %s218_s7, %s327_s8  ;;  %p332_p3 = scmp.lt.s32.totalorder %s218_s7, %s218_s7 }
  0x2f   :  { %p333_p4 = scmp.lt.s32.totalorder %s331_s9, %s327_s8 }
  0x30   :  { %137 = vmatpush1.bf16.msra.mxu0 %v259_v6 }
  0x31   :  { %138 = vmatprep.subr.bf16.mxu0 %v260_v7  ;;  %p334_p5 = por %p333_p4, %p332_p3 }
  0x33   :  { %p335_p6 = pnand %p334_p5, %p328_p2 }
  0x34   :  { %139 = vmatpush1.bf16.msra.mxu0 %v262_v8 }
  0x35   :  { %140 = vmatprep.subr.bf16.mxu0 %v263_v9 }
  0x38   :  { %141 = vmatpush1.bf16.msra.mxu0 %v265_v11 }
  0x39   :  { %142 = vmatprep.subr.bf16.mxu0 %v266_v12 }
  0x3c   :  { %143 = vmatpush1.bf16.msra.mxu0 %v268_v15 }
  0x3d   :  { %144 = vmatprep.subr.bf16.mxu0 %v130_v17 }
  0x40   :  { %145 = vmatpush1.bf16.msra.mxu0 %v127_v18 }
  0x43   :  { %241 = vmatmul.mubr.msk.bf16.vlgmr.msra.gmra.mrb[0].mxu0 %vm119_vm1, %v40_v20 }
 0x116   :  { %v166_v21 = vpop.f32.mrb[0].mxu0 }
 0x117   :  { %v168_v22 = vpop.f32.mrb[1].mxu0  ;;  %v242_v27 = vmul.f32 -1.442695, %v166_v21 }
 0x118   :  { %271 = vtanh.f32 %v168_v22  ;;  %v170_v23 = vpop.f32.mrb[2].mxu0  ;;  %v243_v38 = vmul.f32 -1.442695, %v168_v22 }
 0x119   :  { %v171_v24 = vpop.f32.mrb[3].mxu0  ;;  %273 = vpow2.f32 %v242_v27 }
 0x122   :  { %v272_v25 = vpop.eup %271 }
 0x123   :  { %193 = vrot.lane.b32.xlu0 %v272_v25, %s360_s1  ;;  %v274_v28 = vpop.eup %273 }
 0x124   :  { %v180_v29 = vadd.f32 1.0, %v274_v28 }
 0x126   :  { %275 = vrcp.f32 %v180_v29 }
 0x127   :  { %188 = vrot.lane.b32.xlu0 %v173_v26, %s360_s1 }
 0x130   :  { %v276_v30 = vpop.eup %275 }
 0x195   :  { %v194_v31 = vpop.permute.xlu0 %193 }
 0x196   :  { %v196_v32 = vmul.f32 %v276_v30, %v194_v31 }
 0x198   :  { %198 = vrot.lane.b32.xlu1 %v196_v32, %s360_s1 }
 0x199   :  { %v189_v33 = vpop.permute.xlu0 %188 }
 0x19a   :  { %v191_v34 = vmul.f32 %v276_v30, %v189_v33 }
 0x20a   :  { %v199_v35 = vpop.permute.xlu1 %198 }
 0x20b   :  { %v201_v36 = vadd.f32 %v199_v35, %v191_v34 }
 0x20d   :  { %277 = vtanh.f32 %v201_v36 }
 0x20e   :  { %279 = vpow2.f32 %v243_v38 }
 0x217   :  { %v278_v37 = vpop.eup %277 }
 0x218   :  { %204 = vrot.lane.b32.xlu1 %v278_v37, %s360_s1  ;;  %v280_v39 = vpop.eup %279 }
 0x219   :  { %v181_v40 = vadd.f32 1.0, %v280_v39 }
 0x21b   :  { %281 = vrcp.f32 %v181_v40 }
 0x225   :  { %v282_v41 = vpop.eup %281 }
 0x28a   :  { %v205_v42 = vpop.permute.xlu1 %204 }
 0x28b   :  { %v207_v43 = vmul.f32 %v282_v41, %v205_v42 }
 0x28d   :  { %v209_v44 = vsel %vm208_vm2, %v207_v43, %v201_v36 }
 0x28e   :  { %210 = vst [vmem:[#allocation7] sm:$0x1] %v209_v44 }
 0x28f   :  { %338 = shalt.err (!%p335_p6)
}
 0x290   :  { %s339_s12 = scalar_lea.hbm %s422_s2, 16 }
 0x291   :  { %p340_p7 = scmp.ne.s32.totalorder %s422_s2, %s339_s12  ;;  %p343_p8 = scmp.lt.u32.totalorder %s339_s12, %s422_s2 }
 0x293   :  { %p345_p9 = pnand %p343_p8, %p340_p7 }
 0x295   :  { %348 = shalt.err (!%p345_p9)
}
 0x296   :  { %220 = dma.vmem_to_hbm [thread:$0]  %s218_s7, 16, %s422_s2, [#allocation4]  }
 0x297   :  { %353 = dma.done.wait [#allocation4], 16  }
 0x298   :  { %354 = vsyncadd [#allocation4], 4294967280 }
 0x299   :  { %224 = vsyncpa [#allocation3], 1 }
 0x29a   :  { %225 = vsyncpa [#allocation6], 1 }
 0x29b   :  { %226 = vsyncpa [#allocation4], 1 }

</bundles_post_ra>
